<compile_context>
chip_gen: v5e
topology: v5e:2x2
jax: 0.10.0
libtpu: 0.0.40
codegen_flags: <defaults>
</compile_context>

<pallas_src>
import math
from functools import partial

import jax
import jax.numpy as jnp
from jax.experimental import pallas as pl
from jax.experimental.pallas import tpu as pltpu

_NEG = -1e30                      # finite "minus infinity" (avoids NaN path)


def _vmem_limit_bytes():
    # v5e/v6e have 128 MiB physical VMEM, v7x only 64 MiB: budget ~half of
    # physical so double-buffered tiles + compiler temporaries never spill.
    try:
        cap = getattr(pltpu.get_tpu_info(), "vmem_capacity_bytes", None)
    except Exception:
        cap = None
    if not cap:
        cap = 128 * 1024 * 1024
    return max(32 * 1024 * 1024, min(cap // 2, 64 * 1024 * 1024))


_VMEM_LIMIT = _vmem_limit_bytes()


def _tile(dim, preferred):
    """Largest preferred tile that divides `dim`, else the full dim."""
    for t in preferred:
        if dim >= t and dim % t == 0:
            return t
    return dim


def _head_group(n_head, d_k):
    """Heads per attention grid step: smallest divisor g of n_head with
    g*d_k % 128 == 0 (lane-dense column blocks), else all heads (block == F)."""
    for g in range(1, n_head):
        if n_head % g == 0 and (g * d_k) % 128 == 0:
            return g
    return n_head


# ----------------------------------------------------------------------------
# Tiled matmul kernel (shared by all linear layers)
# ----------------------------------------------------------------------------
def _matmul_kernel(x_ref, w_ref, b_ref, o_ref, acc_ref, *, k_axis):
    k = pl.program_id(k_axis)

    @pl.when(k == 0)
    def _():
        acc_ref[...] = jnp.zeros(acc_ref.shape, jnp.float32)

    acc_ref[...] += jnp.dot(x_ref[...], w_ref[...],
                            preferred_element_type=jnp.float32)

    @pl.when(k == pl.num_programs(k_axis) - 1)
    def _():
        o_ref[...] = (acc_ref[...] + b_ref[...].astype(jnp.float32)
                      ).astype(o_ref.dtype)


def linear(x2d, w_t, b_row, out_dtype=jnp.float32):
    """y = x @ W^T + b with W^T pre-stored as (Fin, Fout) bf16."""
    x2d = x2d.astype(jnp.bfloat16)
    N, Fin = x2d.shape
    Fout = w_t.shape[1]
    tm = _tile(N, (256, 128))
    tn = _tile(Fout, (512, 256, 128))
    tk = _tile(Fin, (512, 256, 128))
    return pl.pallas_call(
        partial(_matmul_kernel, k_axis=2),
        out_shape=jax.ShapeDtypeStruct((N, Fout), out_dtype),
        grid=(N // tm, Fout // tn, Fin // tk),
        in_specs=[
            pl.BlockSpec((tm, tk), lambda i, j, k: (i, k)),
            pl.BlockSpec((tk, tn), lambda i, j, k: (k, j)),
            pl.BlockSpec((1, tn), lambda i, j, k: (0, j)),
        ],
        out_specs=pl.BlockSpec((tm, tn), lambda i, j, k: (i, j)),
        scratch_shapes=[pltpu.VMEM((tm, tn), jnp.float32)],
        compiler_params=pltpu.CompilerParams(
            dimension_semantics=("parallel", "parallel", "arbitrary"),
            vmem_limit_bytes=_VMEM_LIMIT),
    )(x2d, w_t, b_row)


def linear_qkv_fused(x2d, w_qkv_t, b_qkv_row, n_feat, out_dtype=jnp.bfloat16):
    """Fused QKV projection.  Output is written as (3, N, F) so the attention
    kernel can pick Q/K/V by the leading index (no HBM column slices)."""
    x2d = x2d.astype(jnp.bfloat16)
    N, Fin = x2d.shape
    F3 = w_qkv_t.shape[1]
    tm = _tile(N, (256, 128))
    tn = _tile(n_feat, (512, 256, 128))   # tn divides F so no block straddles Q/K/V
    tk = _tile(Fin, (512, 256, 128))
    nf = n_feat // tn
    return pl.pallas_call(
        partial(_matmul_kernel, k_axis=2),
        out_shape=jax.ShapeDtypeStruct((3, N, n_feat), out_dtype),
        grid=(N // tm, F3 // tn, Fin // tk),
        in_specs=[
            pl.BlockSpec((tm, tk), lambda i, j, k: (i, k)),
            pl.BlockSpec((tk, tn), lambda i, j, k: (k, j)),
            pl.BlockSpec((1, tn), lambda i, j, k: (0, j)),
        ],
        out_specs=pl.BlockSpec((None, tm, tn),
                               lambda i, j, k: (j // nf, i, j % nf)),
        scratch_shapes=[pltpu.VMEM((tm, tn), jnp.float32)],
        compiler_params=pltpu.CompilerParams(
            dimension_semantics=("parallel", "parallel", "arbitrary"),
            vmem_limit_bytes=_VMEM_LIMIT),
    )(x2d, w_qkv_t, b_qkv_row)


# ----------------------------------------------------------------------------
# Flash-style attention kernel (online softmax, KV-blocked, head-grouped)
# ----------------------------------------------------------------------------
def _flash_kernel(*refs, dk, g, neg, has_mask):
    if has_mask:
        mask_ref, q_ref, k_ref, v_ref, o_ref, m_sc, l_sc, acc_sc = refs
    else:
        q_ref, k_ref, v_ref, o_ref, m_sc, l_sc, acc_sc = refs

    kv = pl.program_id(3)

    @pl.when(kv == 0)
    def _():
        m_sc[...] = jnp.full(m_sc.shape, neg, jnp.float32)
        l_sc[...] = jnp.zeros(l_sc.shape, jnp.float32)
        acc_sc[...] = jnp.zeros(acc_sc.shape, jnp.float32)

    if has_mask:
        # Shared across all heads in the group: one compare per KV block.
        valid = mask_ref[...] != 0          # (tq, tkv); 0 means masked out

    # Unrolled loop over the g heads of this group (g is a Python constant).
    for h in range(g):
        sl = slice(h * dk, (h + 1) * dk)
        q = q_ref[:, sl]                    # (tq, dk)  bf16, scale folded in
        k = k_ref[:, sl]                    # (tkv, dk) bf16
        s = jax.lax.dot_general(            # (tq, tkv) f32, q @ k^T
            q, k, (((1,), (1,)), ((), ())),
            preferred_element_type=jnp.float32)
        if has_mask:
            s = jnp.where(valid, s, neg)

        m_prev = m_sc[:, h:h + 1]
        m_new = jnp.maximum(m_prev, jnp.max(s, axis=-1, keepdims=True))
        alpha = jnp.exp(m_prev - m_new)
        p = jnp.exp(s - m_new)
        if has_mask:
            # Matches torch's post-softmax masked_fill(mask, 0.0): masked
            # entries never reach the denominator or the accumulator.
            p = jnp.where(valid, p, 0.0)

        l_sc[:, h:h + 1] = alpha * l_sc[:, h:h + 1] + jnp.sum(
            p, axis=-1, keepdims=True)
        acc_sc[:, sl] = alpha * acc_sc[:, sl] + jnp.dot(
            p.astype(v_ref.dtype), v_ref[:, sl],
            preferred_element_type=jnp.float32)
        m_sc[:, h:h + 1] = m_new

    @pl.when(kv == pl.num_programs(3) - 1)
    def _():
        for h in range(g):
            sl = slice(h * dk, (h + 1) * dk)
            l = l_sc[:, h:h + 1]
            l = jnp.where(l == 0.0, 1.0, l)        # fully-masked rows -> 0
            o_ref[:, sl] = (acc_sc[:, sl] * pl.reciprocal(l)   # exact recip
                            ).astype(o_ref.dtype)


def _src_spec(src, sel, t_block, gdk, is_query):
    """BlockSpec pulling one head-group column block (width gdk) straight out
    of the projection layout.  `src` is (B, T, F) or a fused (3, B, T, F)
    buffer selected by the leading index `sel`."""
    if src.ndim == 4:
        if is_query:
            def imap(b, g, i, j):
                return (sel, b, i, g)
        else:
            def imap(b, g, i, j):
                return (sel, b, j, g)
        return pl.BlockSpec((None, None, t_block, gdk), imap)
    if is_query:
        def imap(b, g, i, j):
            return (b, i, g)
    else:
        def imap(b, g, i, j):
            return (b, j, g)
    return pl.BlockSpec((None, t_block, gdk), imap)


def attention_core(q_src, k_src, v_src, mask, *, n_head, d_k,
                   out_dtype=jnp.bfloat16):
    """q_src/k_src/v_src: (B, T, F) projections, or the same fused (3, B, T, F)
    buffer passed three times (self-attention).  mask: (B, T1, T2) or None.
    Output: (B, T1, F) with head h occupying columns [h*d_k, (h+1)*d_k)."""
    if q_src.ndim == 4:
        _, B, T1, F = q_src.shape
        T2 = k_src.shape[2]
    else:
        B, T1, F = q_src.shape
        T2 = k_src.shape[1]
    assert F == n_head * d_k

    G = _head_group(n_head, d_k)
    gdk = G * d_k
    tq = _tile(T1, (128, 256))            # 128 keeps v5e VALU/store pressure low
    tkv = _tile(T2, (512, 256, 128))
    has_mask = mask is not None

    in_specs = []
    args = []
    if has_mask:
        in_specs.append(pl.BlockSpec((None, tq, tkv),
                                     lambda b, g, i, j: (b, i, j)))
        args.append(mask)
    in_specs += [
        _src_spec(q_src, 0, tq, gdk, is_query=True),
        _src_spec(k_src, 1, tkv, gdk, is_query=False),
        _src_spec(v_src, 2, tkv, gdk, is_query=False),
    ]
    args += [q_src, k_src, v_src]

    # Note: for very long T2, pipeline_mode=pl.Buffered(3) on the K/V specs can
    # hide more of the copy (watch the 64 MiB VMEM budget on v7x).
    return pl.pallas_call(
        partial(_flash_kernel, dk=d_k, g=G, neg=_NEG, has_mask=has_mask),
        out_shape=jax.ShapeDtypeStruct((B, T1, F), out_dtype),
        grid=(B, n_head // G, T1 // tq, T2 // tkv),
        in_specs=in_specs,
        out_specs=pl.BlockSpec((None, tq, gdk), lambda b, g, i, j: (b, i, g)),
        scratch_shapes=[pltpu.VMEM((tq, G), jnp.float32),
                        pltpu.VMEM((tq, G), jnp.float32),
                        pltpu.VMEM((tq, gdk), jnp.float32)],
        compiler_params=pltpu.CompilerParams(
            dimension_semantics=("parallel", "parallel", "parallel", "arbitrary"),
            vmem_limit_bytes=_VMEM_LIMIT),
    )(*args)


# ----------------------------------------------------------------------------
# Module wrapper
# ----------------------------------------------------------------------------
class MultiHeadedAttentionPallas:
    def __init__(self, n_head, n_feat, dropout_rate, key):
        assert n_feat % n_head == 0
        self.d_k = n_feat // n_head
        self.h = n_head
        self.n_feat = n_feat
        self.dropout_rate = dropout_rate  # inference: identity
        ks = jax.random.split(key, 8)
        s = 1.0 / math.sqrt(n_feat)

        def w(k):
            return jax.random.uniform(k, (n_feat, n_feat), jnp.float32, -s, s)

        def b(k):
            return jax.random.uniform(k, (n_feat,), jnp.float32, -s, s)

        w_q, w_k, w_v, w_o = w(ks[0]), w(ks[2]), w(ks[4]), w(ks[6])
        b_q, b_k, b_v, b_o = b(ks[1]), b(ks[3]), b(ks[5]), b(ks[7])

        # 1/sqrt(d_k) folded into the Q projection (f32 fold, then bf16 cast for
        # the weight; bias stays f32) -> no per-KV-step scale multiply in-kernel.
        scale = 1.0 / math.sqrt(self.d_k)
        self.w_q_t = jnp.asarray(w_q.T * scale, jnp.bfloat16)
        self.w_k_t = jnp.asarray(w_k.T, jnp.bfloat16)
        self.w_v_t = jnp.asarray(w_v.T, jnp.bfloat16)
        self.b_q = (b_q * scale).reshape(1, n_feat)
        self.b_k = b_k.reshape(1, n_feat)
        self.b_v = b_v.reshape(1, n_feat)
        # Fused QKV weights (self-attention fast path: one HBM read of x).
        self.w_qkv_t = jnp.concatenate([self.w_q_t, self.w_k_t, self.w_v_t], axis=1)
        self.b_qkv = jnp.concatenate([self.b_q, self.b_k, self.b_v], axis=1)
        # Output projection: plain (F, F) pre-transposed weight -> deep-K matmul
        # over the lane-dense (B*T1, F) activation the attention kernel emits.
        self.w_o_t = jnp.asarray(w_o.T, jnp.bfloat16)
        self.b_o = b_o.reshape(1, n_feat)

    def __call__(self, query, key, value, mask=None):
        # query: (B, T1, F), key/value: (B, T2, F), mask: (B, T1, T2) or None
        B, T1, F = query.shape
        T2 = key.shape[1]
        H, Dk = self.h, self.d_k

        if mask is not None and mask.dtype.itemsize > 1:
            # One-off narrowing; callers should pass int8/bool to skip this pass.
            mask = mask.astype(jnp.int8)

        if query is key and key is value:
            # Self-attention: single fused QKV matmul; the (3, B, T, F) buffer
            # is read per head-group straight by the flash kernel (no slices).
            qkv = linear_qkv_fused(query.reshape(B * T1, F), self.w_qkv_t,
                                   self.b_qkv, F)
            qkv = qkv.reshape(3, B, T1, F)
            x = attention_core(qkv, qkv, qkv, mask, n_head=H, d_k=Dk)
        else:
            q3 = linear(query.reshape(B * T1, F), self.w_q_t, self.b_q,
                        out_dtype=jnp.bfloat16).reshape(B, T1, F)
            k3 = linear(key.reshape(B * T2, F), self.w_k_t, self.b_k,
                        out_dtype=jnp.bfloat16).reshape(B, T2, F)
            v3 = linear(value.reshape(B * T2, F), self.w_v_t, self.b_v,
                        out_dtype=jnp.bfloat16).reshape(B, T2, F)
            x = attention_core(q3, k3, v3, mask, n_head=H, d_k=Dk)

        # x is already (B, T1, F) lane-dense -> plain deep-K output projection.
        return linear(x.reshape(B * T1, F), self.w_o_t, self.b_o,
                      out_dtype=jnp.float32).reshape(B, T1, F)


# ----------------------------------------------------------------------------
# Pure-JAX reference (uses the same bf16 weights, f32 math) for a sanity check.
# ----------------------------------------------------------------------------
def _ref_forward(m, query, key, value, mask):
    def lin(x, w_t, b):
        return x @ w_t.astype(jnp.float32) + b
    B, T1, F = query.shape
    T2 = key.shape[1]
    q = lin(query, m.w_q_t, m.b_q)   # scale already folded into w_q_t / b_q
    k = lin(key, m.w_k_t, m.b_k)
    v = lin(value, m.w_v_t, m.b_v)
    q = q.reshape(B, T1, m.h, m.d_k).transpose(0, 2, 1, 3)
    k = k.reshape(B, T2, m.h, m.d_k).transpose(0, 2, 1, 3)
    v = v.reshape(B, T2, m.h, m.d_k).transpose(0, 2, 1, 3)
    s = jnp.einsum("bhqd,bhkd->bhqk", q, k)
    if mask is not None:
        valid = mask[:, None, :, :] != 0
        s = jnp.where(valid, s, -jnp.inf)
        a = jax.nn.softmax(s, axis=-1)
        a = jnp.where(valid, a, 0.0)
    else:
        a = jax.nn.softmax(s, axis=-1)
    x = jnp.einsum("bhqk,bhkd->bhqd", a, v).transpose(0, 2, 1, 3)
    x = x.reshape(B, T1, F)
    return x @ m.w_o_t.astype(jnp.float32) + m.b_o


# ----------------------------------------------------------------------------
if __name__ == "__main__":
    B, T, F, H = 2, 8, 32, 4
    key = jax.random.PRNGKey(0)
    kq, kk, kv, kp = jax.random.split(key, 4)

    query = jax.random.normal(kq, (B, T, F), jnp.float32)
    keyt = jax.random.normal(kk, (B, T, F), jnp.float32)
    value = jax.random.normal(kv, (B, T, F), jnp.float32)

    # lengths-based mask: batch 0 attends to first 6 frames, batch 1 to all 8
    lengths = jnp.array([6, 8], dtype=jnp.int32)
    valid = jnp.arange(T)[None, :] < lengths[:, None]                   # (B, T2)
    mask = jnp.broadcast_to(valid[:, None, :], (B, T, T)).astype(jnp.int8)

    mha = MultiHeadedAttentionPallas(n_head=H, n_feat=F, dropout_rate=0.0, key=kp)

    out = mha(query, keyt, value, mask)          # cross-attention path
    out_self = mha(query, query, query, mask)    # fused-QKV self-attention path
    out_nomask = mha(query, keyt, value, None)   # mask=None path
    jax.block_until_ready((out, out_self, out_nomask))

    assert out.shape == (B, T, F)
    assert out_self.shape == (B, T, F)
    assert out_nomask.shape == (B, T, F)

    ref = _ref_forward(mha, query, keyt, value, mask)
    ref_self = _ref_forward(mha, query, query, query, mask)
    ref_nomask = _ref_forward(mha, query, keyt, value, None)
    assert bool(jnp.allclose(out, ref, atol=5e-2, rtol=5e-2))
    assert bool(jnp.allclose(out_self, ref_self, atol=5e-2, rtol=5e-2))
    assert bool(jnp.allclose(out_nomask, ref_nomask, atol=5e-2, rtol=5e-2))

    print("KERNEL_OK")
</pallas_src>

<mosaic_0001>
module attributes {stable_mosaic.version = 11 : i64} {
  func.func @_matmul_kernel(%arg0: i32, %arg1: i32, %arg2: i32, %arg3: memref<16x32xbf16, #tpu.memory_space<vmem>>, %arg4: memref<32x32xbf16, #tpu.memory_space<vmem>>, %arg5: memref<1x32xf32, #tpu.memory_space<vmem>>, %arg6: memref<16x32xbf16, #tpu.memory_space<vmem>>, %arg7: memref<16x32xf32, #tpu.memory_space<vmem>>) attributes {dimension_semantics = [#tpu.dimension_semantics<parallel>, #tpu.dimension_semantics<parallel>, #tpu.dimension_semantics<arbitrary>], iteration_bounds = array<i64: 1, 1, 1>, scalar_prefetch = 0 : i64, scratch_operands = 1 : i64, tpu.core_type = #tpu.core_type<tc>, window_params = [{transform_indices = @transform_0, window_bounds = array<i64: 16, 32>}, {transform_indices = @transform_1, window_bounds = array<i64: 32, 32>}, {transform_indices = @transform_2, window_bounds = array<i64: 1, 32>}, {transform_indices = @transform_3, window_bounds = array<i64: 16, 32>}]} {
    %c0_i32 = arith.constant 0 : i32
    %0 = arith.cmpi eq, %arg2, %c0_i32 : i32
    %1 = arith.extui %0 : i1 to i32
    %c0_i32_0 = arith.constant 0 : i32
    %2 = arith.cmpi ne, %1, %c0_i32_0 : i32
    scf.if %2 {
      %cst_10 = arith.constant 0.000000e+00 : f32
      %12 = vector.broadcast %cst_10 : f32 to vector<16x32xf32>
      %c0_11 = arith.constant 0 : index
      %c0_12 = arith.constant 0 : index
      %13 = vector.load %arg7[%c0_11, %c0_12] : memref<16x32xf32, #tpu.memory_space<vmem>>, vector<16x32xf32>
      tpu.vector_store %arg7[%c0_11, %c0_12], %12 {strides = array<i32>} : memref<16x32xf32, #tpu.memory_space<vmem>>, vector<16x32xf32>,
    } else {
    }
    %c0 = arith.constant 0 : index
    %c0_1 = arith.constant 0 : index
    %3 = vector.load %arg7[%c0, %c0_1] : memref<16x32xf32, #tpu.memory_space<vmem>>, vector<16x32xf32>
    %c0_2 = arith.constant 0 : index
    %c0_3 = arith.constant 0 : index
    %4 = vector.load %arg3[%c0_2, %c0_3] : memref<16x32xbf16, #tpu.memory_space<vmem>>, vector<16x32xbf16>
    %c0_4 = arith.constant 0 : index
    %c0_5 = arith.constant 0 : index
    %5 = vector.load %arg4[%c0_4, %c0_5] : memref<32x32xbf16, #tpu.memory_space<vmem>>, vector<32x32xbf16>
    %cst = arith.constant dense<0.000000e+00> : vector<16x32xf32>
    %6 = tpu.matmul %4, %5, %cst {dimension_numbers = #tpu.dot_dimension_numbers<[1], [0], [0], [1], [0, 0, 1, 1], [], []>} : vector<16x32xbf16>, vector<32x32xbf16>, vector<16x32xf32> -> vector<16x32xf32>
    %7 = arith.addf %3, %6 : vector<16x32xf32>
    %c0_6 = arith.constant 0 : index
    %c0_7 = arith.constant 0 : index
    %8 = vector.load %arg7[%c0_6, %c0_7] : memref<16x32xf32, #tpu.memory_space<vmem>>, vector<16x32xf32>
    tpu.vector_store %arg7[%c0_6, %c0_7], %7 {strides = array<i32>} : memref<16x32xf32, #tpu.memory_space<vmem>>, vector<16x32xf32>,
    %c0_i32_8 = arith.constant 0 : i32
    %9 = arith.cmpi eq, %arg2, %c0_i32_8 : i32
    %10 = arith.extui %9 : i1 to i32
    %c0_i32_9 = arith.constant 0 : i32
    %11 = arith.cmpi ne, %10, %c0_i32_9 : i32
    scf.if %11 {
      %c0_10 = arith.constant 0 : index
      %c0_11 = arith.constant 0 : index
      %12 = vector.load %arg7[%c0_10, %c0_11] : memref<16x32xf32, #tpu.memory_space<vmem>>, vector<16x32xf32>
      %c0_12 = arith.constant 0 : index
      %c0_13 = arith.constant 0 : index
      %13 = vector.load %arg5[%c0_12, %c0_13] : memref<1x32xf32, #tpu.memory_space<vmem>>, vector<1x32xf32>
      %14 = vector.broadcast %13 : vector<1x32xf32> to vector<16x32xf32>
      %15 = arith.addf %12, %14 : vector<16x32xf32>
      %16 = arith.truncf %15 : vector<16x32xf32> to vector<16x32xbf16>
      %c0_14 = arith.constant 0 : index
      %c0_15 = arith.constant 0 : index
      %17 = vector.load %arg6[%c0_14, %c0_15] : memref<16x32xbf16, #tpu.memory_space<vmem>>, vector<16x32xbf16>
      tpu.vector_store %arg6[%c0_14, %c0_15], %16 {strides = array<i32>} : memref<16x32xbf16, #tpu.memory_space<vmem>>, vector<16x32xbf16>,
    } else {
    }
    return
  }
  func.func @transform_0(%arg0: i32, %arg1: i32, %arg2: i32) -> (i32, i32) {
    %c0_i32 = arith.constant 0 : i32
    return %arg0, %arg2 : i32, i32
  }
  func.func @transform_1(%arg0: i32, %arg1: i32, %arg2: i32) -> (i32, i32) {
    %c0_i32 = arith.constant 0 : i32
    return %arg2, %arg1 : i32, i32
  }
  func.func @transform_2(%arg0: i32, %arg1: i32, %arg2: i32) -> (i32, i32) {
    %c0_i32 = arith.constant 0 : i32
    %c0_i32_0 = arith.constant 0 : i32
    return %c0_i32, %arg1 : i32, i32
  }
  func.func @transform_3(%arg0: i32, %arg1: i32, %arg2: i32) -> (i32, i32) {
    %c0_i32 = arith.constant 0 : i32
    return %arg0, %arg1 : i32, i32
  }
}

</mosaic_0001>

<bundles_post_ra>
// kernel: tpu_custom_call.1
= control target key start
LH: loop header
LB: loop body
LE: loop exit
PB: predicated region body
PF: predicated region fallthrough
CT: control target
= control target key end

     0   :  { %8 = vsyncpa [#allocation4], 0  ;;  %s291_s0 = inlined_call_operand.hbm [shape: bf16[16,32], index: 0, kind: input, shape index: {}]   ;;  %s292_s1 = inlined_call_operand.hbm [shape: bf16[32,32], index: 1, kind: input, shape index: {}]   ;;  %s293_s2 = inlined_call_operand.vmem [shape: f32[1,32], index: 2, kind: input, shape index: {}]   ;;  %s294_s3 = inlined_call_operand.hbm [shape: bf16[16,32], index: 3, kind: output, shape index: {}]  }
   0x1   :  { %9 = vsyncpa [#allocation7], 0 }
   0x2   :  { %10 = vsyncpa [#allocation5], 0  ;;  %s15_s14 = sshll.u32 %s291_s0, 4  ;;  %s239_s15 = smov [#allocation3]   ;;  %s16_s14 = int_to_ptr.hbm [resolvable:$true] %s15_s14 }
   0x3   :  { %s17_s16 = sshll.u32 %s239_s15, 4  ;;  %s28_s19 = sshll.u32 %s292_s1, 4  ;;  %s18_s16 = int_to_ptr.vmem [resolvable:$true] %s17_s16  ;;  %s29_s19 = int_to_ptr.hbm [resolvable:$true] %s28_s19 }
   0x4   :  { %s240_s20 = smov 64   ;;  %s241_s21 = smov 4  }
   0x5   :  { %23 = dma.hbm_to_vmem [thread:$0]  %s16_s14, 128, %s18_s16, [#allocation4], %s240_s20, %s240_s20, %s241_s21  }
   0x6   :  { %s242_s22 = smov [#allocation6]  }
   0x7   :  { %s30_s23 = sshll.u32 %s242_s22, 4  ;;  %s31_s23 = int_to_ptr.vmem [resolvable:$true] %s30_s23 }
   0x8   :  { %36 = dma.hbm_to_vmem [thread:$0]  %s29_s19, 256, %s31_s23, [#allocation7], %s240_s20, %s240_s20, %s241_s21  }
   0x9   :  { %233 = dma.done.wait [#allocation4], 128  }
   0xa   :  { %234 = vsyncadd [#allocation4], 4294967168 }
   0xb   :  { %235 = dma.done.wait [#allocation7], 256  }
   0xc   :  { %236 = vsyncadd [#allocation7], 4294967040  ;;  %vm52_vm0 = vcmask 261120   ;;  %v243_v0 = vmov 0.0   ;;  %v153_v1 = vld [vmem:[#allocation6 + $0x8] sm:$0xff]  ;;  %v152_v2 = vld [vmem:[#allocation6] sm:$0xff] }
   0xd   :  { %53 = vst.msk [vmem:[#allocation2] sm:$0xff] %vm52_vm0, %v243_v0  ;;  %90 = vmatpush.bf16.msra.mxu0 %v153_v1  ;;  %v151_v3 = vld [vmem:[#allocation3] sm:$0xff]  ;;  %v160_v8 = vld [vmem:[%s293_s2] ss:$0 sm:$0xff]  ;;  %vm115_vm1 = vcmask 257024   ;;  %s244_s24 = smov [#allocation8]  }
   0xe   :  { %54 = vst.msk [vmem:[#allocation2 + $0x8] sm:$0xff] %vm52_vm0, %v243_v0  ;;  %s122_s25 = sshll.u32 %s244_s24, 4  ;;  %s124_s28 = sshll.u32 %s294_s3, 4  ;;  %s123_s25 = int_to_ptr.vmem [resolvable:$true] %s122_s25  ;;  %s125_s28 = int_to_ptr.hbm [resolvable:$true] %s124_s28 }
  0x11   :  { %91 = vmatpush.bf16.msra.mxu0 %v152_v2 }
  0x14   :  { %150 = vmatmul.msk.bf16.vlgmr.msra.gmra.mxu0 %vm52_vm0, %v151_v3  ;;  %v55_v4 = vld [vmem:[#allocation2] sm:$0xff] }
  0x15   :  { %v56_v7 = vld [vmem:[#allocation2 + $0x8] sm:$0xff] }
  0x91   :  { %v93_v5 = vpop.f32.mrf.mxu0 }
  0x92   :  { %v98_v6 = vadd.f32 %v93_v5, %v55_v4 }
  0x94   :  { %100 = vst.msk [vmem:[#allocation2] sm:$0xff] %vm52_vm0, %v98_v6 }
  0x99   :  { %v95_v9 = vpop.f32.mrf.mxu0 }
  0x9a   :  { %v99_v10 = vadd.f32 %v95_v9, %v56_v7 }
  0x9b   :  { %v105_v11 = vld [vmem:[#allocation2] sm:$0xff] }
  0x9c   :  { %101 = vst.msk [vmem:[#allocation2 + $0x8] sm:$0xff] %vm52_vm0, %v99_v10  ;;  %v111_v12 = vadd.f32 %v160_v8, %v105_v11 }
  0x9e   :  { %v113_v13 = vpack.c.bf16 %v111_v12, %v111_v12 }
  0xa0   :  { %116 = vst.msk [vmem:[#allocation8] sm:$0xf] %vm115_vm1, %v113_v13 }
  0xa3   :  { %v106_v14 = vld [vmem:[#allocation2 + $0x8] sm:$0xff] }
  0xa4   :  { %v112_v15 = vadd.f32 %v160_v8, %v106_v14 }
  0xa6   :  { %v114_v16 = vpack.c.bf16 %v112_v15, %v112_v15 }
  0xa8   :  { %117 = vst.msk [vmem:[#allocation8 + $0x4] sm:$0xf] %vm115_vm1, %v114_v16 }
  0xa9   :  { %130 = dma.vmem_to_hbm [thread:$0]  %s123_s25, 128, %s125_s28, [#allocation5], %s240_s20, %s240_s20, %s241_s21  }
  0xaa   :  { %237 = dma.done.wait [#allocation5], 128  }
  0xab   :  { %238 = vsyncadd [#allocation5], 4294967168 }
  0xac   :  { %135 = vsyncpa [#allocation4], 1 }
  0xad   :  { %136 = vsyncpa [#allocation7], 1 }
  0xae   :  { %137 = vsyncpa [#allocation5], 1 }

</bundles_post_ra>
